<compile_context>
chip_gen: v7x
topology: tpu7x:2x2x1
jax: 0.10.0
libtpu: 0.0.40
codegen_flags: <defaults>
</compile_context>

<pallas_src>
import jax
import jax.numpy as jnp
from jax import lax
from jax.experimental import pallas as pl
from jax.experimental.pallas import tpu as pltpu


DEPTH = 3
IN_FILTERS = 2
OUT_FILTERS = 16
KERNEL_SIZE = 3  # taps along H; kernel is (3, 1) so W needs no padding


def _make_kernel(depth, n, w_sp, l_sp):
    """depth conv(3x1,'same')+ReLU layers, batch folded onto the lane axis."""
    nl = n * l_sp

    def kernel(x_ref, w0_ref, wr_ref, b_ref, o_ref):
        # ---- fold batch into lanes: (N, C0, L) -> (C0, N*L) -----------------
        # L is a multiple of 128, so this is an aligned vreg placement.
        x = jnp.concatenate([x_ref[i].astype(jnp.float32) for i in range(n)],
                            axis=1)                                   # (C0, NL)

        # ---- boundary masks, built once, reused by every layer --------------
        lane = lax.broadcasted_iota(jnp.int32, (1, nl), 1)
        lane_mod = lane % l_sp
        keep_prev = lane_mod >= w_sp            # zero first H-row of each sample
        keep_next = lane_mod < (l_sp - w_sp)    # zero last  H-row of each sample

        def taps(y):
            # tap kh=0 reads y[h-1]; tap kh=2 reads y[h+1].  Rolls are over the
            # full N*L lane axis; the (lane % L) masks kill both the 'same'
            # padding rows and any cross-sample leakage from the roll.
            y_prev = jnp.where(keep_prev, pltpu.roll(y, shift=w_sp, axis=1), 0.0)
            y_next = jnp.where(keep_next, pltpu.roll(y, shift=nl - w_sp, axis=1), 0.0)
            return y_prev, y_next

        # ---- layer 0: Ci0 = 2 (not 8-aligned) -> 3 accumulated dots ----------
        x_prev, x_next = taps(x)
        y = (jnp.dot(w0_ref[0], x_prev, preferred_element_type=jnp.float32)
             + jnp.dot(w0_ref[1], x, preferred_element_type=jnp.float32)
             + jnp.dot(w0_ref[2], x_next, preferred_element_type=jnp.float32)
             + b_ref[0])
        y = jnp.maximum(y, 0.0)

        # ---- layers 1..depth-1: Ci = 16 (8-aligned) -> im2col concat + dot ---
        for i in range(1, depth):
            y_prev, y_next = taps(y)
            k = jnp.concatenate([y_prev, y, y_next], axis=0)          # (3*Ci, NL)
            y = jnp.dot(wr_ref[i - 1], k,
                        preferred_element_type=jnp.float32) + b_ref[i]
            y = jnp.maximum(y, 0.0)

        # ---- un-fold batch from lanes (128-aligned static lane slices) -------
        for i in range(n):
            o_ref[i] = y[:, i * l_sp:(i + 1) * l_sp].astype(o_ref.dtype)

    return kernel


def _pack_params(torch_params):
    """torch layout (Co, Ci, kH, 1) + (Co,) -> packed kernel operands."""
    depth = len(torch_params)
    co = torch_params[0][0].shape[0]
    ks = torch_params[0][0].shape[2]
    # layer 0: per-tap weights, shape (kH, Co, Ci0)
    w0 = jnp.transpose(torch_params[0][0][:, :, :, 0], (2, 0, 1))
    # layers 1..: im2col rows ordered kh*Ci + ci, stacked -> (depth-1, Co, kH*Ci)
    if depth > 1:
        w_rest = jnp.stack([
            jnp.transpose(w[:, :, :, 0], (0, 2, 1)).reshape(co, ks * w.shape[1])
            for (w, _) in torch_params[1:]
        ], axis=0)
    else:
        w_rest = jnp.zeros((1, co, ks * co), jnp.float32)  # unused placeholder
    b_all = jnp.stack([b.reshape(co, 1) for (_, b) in torch_params], axis=0)
    return w0, w_rest, b_all


def cnn1d_single_chain(x_nchw, torch_params):
    """Matches CNN1DSingleChain.forward: NCHW in, NCHW out. One fused pallas_call."""
    n, c0, h, w = x_nchw.shape
    l = h * w
    depth = len(torch_params)
    co = torch_params[0][0].shape[0]

    w0, w_rest, b_all = _pack_params(torch_params)
    x3d = x_nchw.reshape(n, c0, l)                      # free, NCHW-contiguous

    out = pl.pallas_call(
        _make_kernel(depth, n, w, l),
        out_shape=jax.ShapeDtypeStruct((n, co, l), x_nchw.dtype),
        grid=(1,),
        in_specs=[
            pl.BlockSpec((n, c0, l), lambda i: (0, 0, 0)),
            pl.BlockSpec(w0.shape, lambda i: (0, 0, 0)),
            pl.BlockSpec(w_rest.shape, lambda i: (0, 0, 0)),
            pl.BlockSpec(b_all.shape, lambda i: (0, 0, 0)),
        ],
        out_specs=pl.BlockSpec((n, co, l), lambda i: (0, 0, 0)),
        compiler_params=pltpu.CompilerParams(
            dimension_semantics=("arbitrary",)),
    )(x3d, w0, w_rest, b_all)
    return out.reshape(n, co, h, w)


def init_params(key, depth=DEPTH, input_filters=IN_FILTERS,
                output_filters=OUT_FILTERS, kernel_size=KERNEL_SIZE):
    """Deterministic synthetic params in PyTorch layout: [(w (Co,Ci,kH,1), b (Co,)), ...]."""
    in_ch = [input_filters] + [output_filters] * (depth - 1)
    params = []
    for i in range(depth):
        key, kw, kb = jax.random.split(key, 3)
        wt = jax.random.uniform(kw, (output_filters, in_ch[i], kernel_size, 1),
                                minval=-0.1, maxval=0.1, dtype=jnp.float32)
        b = jax.random.uniform(kb, (output_filters,), minval=-0.1, maxval=0.1,
                               dtype=jnp.float32)
        params.append((wt, b))
    return params


def reference(x_nchw, torch_params):
    """Pure-JAX reference (lax conv), same semantics as the PyTorch module."""
    y = x_nchw
    for (wt, b) in torch_params:
        y = lax.conv_general_dilated(
            y, wt, window_strides=(1, 1), padding="SAME",
            dimension_numbers=("NCHW", "OIHW", "NCHW"))
        y = jax.nn.relu(y + b[None, :, None, None])
    return y


if __name__ == "__main__":
    key = jax.random.PRNGKey(0)
    key, kx = jax.random.split(key)

    # Shapes implied by the module defaults: N=2, C_in=2 (input_filters), H=W=16.
    x = jax.random.normal(kx, (2, IN_FILTERS, 16, 16), dtype=jnp.float32)
    torch_params = init_params(key)

    out = jax.block_until_ready(cnn1d_single_chain(x, torch_params))
    ref = jax.block_until_ready(reference(x, torch_params))

    assert out.shape == (2, OUT_FILTERS, 16, 16), out.shape
    max_err = float(jnp.max(jnp.abs(out - ref)))
    assert jnp.allclose(out, ref, rtol=1e-4, atol=1e-5), max_err
    print("KERNEL_OK")
</pallas_src>

<mosaic_0001>
module attributes {stable_mosaic.version = 11 : i64} {
  func.func @kernel(%arg0: i32, %arg1: memref<2x2x256xf32, #tpu.memory_space<vmem>>, %arg2: memref<3x16x2xf32, #tpu.memory_space<vmem>>, %arg3: memref<2x16x48xf32, #tpu.memory_space<vmem>>, %arg4: memref<3x16x1xf32, #tpu.memory_space<vmem>>, %arg5: memref<2x16x256xf32, #tpu.memory_space<vmem>>) attributes {dimension_semantics = [#tpu.dimension_semantics<arbitrary>], iteration_bounds = array<i64: 1>, scalar_prefetch = 0 : i64, scratch_operands = 0 : i64, tpu.core_type = #tpu.core_type<tc>, window_params = [{pipeline_mode = #tpu.pipeline_mode<synchronous>, transform_indices = @transform_0, window_bounds = array<i64: 2, 2, 256>}, {pipeline_mode = #tpu.pipeline_mode<synchronous>, transform_indices = @transform_1, window_bounds = array<i64: 3, 16, 2>}, {pipeline_mode = #tpu.pipeline_mode<synchronous>, transform_indices = @transform_2, window_bounds = array<i64: 2, 16, 48>}, {pipeline_mode = #tpu.pipeline_mode<synchronous>, transform_indices = @transform_3, window_bounds = array<i64: 3, 16, 1>}, {pipeline_mode = #tpu.pipeline_mode<synchronous>, transform_indices = @transform_4, window_bounds = array<i64: 2, 16, 256>}]} {
    %c0 = arith.constant 0 : index
    %c0_0 = arith.constant 0 : index
    %c0_1 = arith.constant 0 : index
    %0 = vector.load %arg1[%c0, %c0_0, %c0_1] : memref<2x2x256xf32, #tpu.memory_space<vmem>>, vector<1x2x256xf32>
    %1 = vector.shape_cast %0 : vector<1x2x256xf32> to vector<2x256xf32>
    %c1 = arith.constant 1 : index
    %c0_2 = arith.constant 0 : index
    %c0_3 = arith.constant 0 : index
    %2 = vector.load %arg1[%c1, %c0_2, %c0_3] : memref<2x2x256xf32, #tpu.memory_space<vmem>>, vector<1x2x256xf32>
    %3 = vector.shape_cast %2 : vector<1x2x256xf32> to vector<2x256xf32>
    %4 = tpu.concatenate %1, %3 in 1 : vector<2x256xf32>, vector<2x256xf32> -> vector<2x512xf32>
    %5 = tpu.iota {dimensions = array<i32: 1>} : vector<1x512xi32>
    %c256_i32 = arith.constant 256 : i32
    %c0_i32 = arith.constant 0 : i32
    %6 = arith.cmpi eq, %c256_i32, %c0_i32 : i32
    %c1_i32 = arith.constant 1 : i32
    %7 = arith.select %6, %c1_i32, %c256_i32 : i32
    %8 = vector.broadcast %7 : i32 to vector<1x512xi32>
    %9 = arith.remsi %5, %8 : vector<1x512xi32>
    %c0_i32_4 = arith.constant 0 : i32
    %10 = vector.broadcast %c0_i32_4 : i32 to vector<1x512xi32>
    %11 = arith.cmpi ne, %9, %10 : vector<1x512xi32>
    %c0_i32_5 = arith.constant 0 : i32
    %12 = vector.broadcast %c0_i32_5 : i32 to vector<1x512xi32>
    %13 = arith.cmpi slt, %9, %12 : vector<1x512xi32>
    %c0_i32_6 = arith.constant 0 : i32
    %14 = arith.cmpi slt, %7, %c0_i32_6 : i32
    %15 = vector.broadcast %14 : i1 to vector<1x512xi1>
    %16 = vector.broadcast %15 : vector<1x512xi1> to vector<1x512xi1>
    %17 = arith.xori %13, %16 : vector<1x512xi1>
    %18 = arith.andi %17, %11 : vector<1x512xi1>
    %19 = vector.broadcast %7 : i32 to vector<1x512xi32>
    %20 = arith.addi %9, %19 : vector<1x512xi32>
    %21 = arith.select %18, %20, %9 : vector<1x512xi1>, vector<1x512xi32>
    %c16_i32 = arith.constant 16 : i32
    %22 = vector.broadcast %c16_i32 : i32 to vector<1x512xi32>
    %23 = arith.cmpi sge, %21, %22 : vector<1x512xi32>
    %c240_i32 = arith.constant 240 : i32
    %24 = vector.broadcast %c240_i32 : i32 to vector<1x512xi32>
    %25 = arith.cmpi slt, %21, %24 : vector<1x512xi32>
    %c16_i32_7 = arith.constant 16 : i32
    %26 = tpu.dynamic_rotate %4 by %c16_i32_7 dim 1 : vector<2x512xf32>, i32 -> vector<2x512xf32>
    %cst = arith.constant 0.000000e+00 : f32
    %27 = vector.shape_cast %23 : vector<1x512xi1> to vector<1x512xi1>
    %28 = vector.broadcast %27 : vector<1x512xi1> to vector<2x512xi1>
    %29 = vector.broadcast %cst : f32 to vector<2x512xf32>
    %30 = arith.select %28, %26, %29 : vector<2x512xi1>, vector<2x512xf32>
    %c496_i32 = arith.constant 496 : i32
    %31 = tpu.dynamic_rotate %4 by %c496_i32 dim 1 : vector<2x512xf32>, i32 -> vector<2x512xf32>
    %cst_8 = arith.constant 0.000000e+00 : f32
    %32 = vector.shape_cast %25 : vector<1x512xi1> to vector<1x512xi1>
    %33 = vector.broadcast %32 : vector<1x512xi1> to vector<2x512xi1>
    %34 = vector.broadcast %cst_8 : f32 to vector<2x512xf32>
    %35 = arith.select %33, %31, %34 : vector<2x512xi1>, vector<2x512xf32>
    %c0_9 = arith.constant 0 : index
    %c0_10 = arith.constant 0 : index
    %c0_11 = arith.constant 0 : index
    %36 = vector.load %arg2[%c0_9, %c0_10, %c0_11] : memref<3x16x2xf32, #tpu.memory_space<vmem>>, vector<1x16x2xf32>
    %37 = vector.shape_cast %36 : vector<1x16x2xf32> to vector<16x2xf32>
    %cst_12 = arith.constant dense<0.000000e+00> : vector<16x512xf32>
    %38 = tpu.matmul %37, %30, %cst_12 {dimension_numbers = #tpu.dot_dimension_numbers<[1], [0], [0], [1], [0, 0, 1, 1], [], []>} : vector<16x2xf32>, vector<2x512xf32>, vector<16x512xf32> -> vector<16x512xf32>
    %c1_13 = arith.constant 1 : index
    %c0_14 = arith.constant 0 : index
    %c0_15 = arith.constant 0 : index
    %39 = vector.load %arg2[%c1_13, %c0_14, %c0_15] : memref<3x16x2xf32, #tpu.memory_space<vmem>>, vector<1x16x2xf32>
    %40 = vector.shape_cast %39 : vector<1x16x2xf32> to vector<16x2xf32>
    %cst_16 = arith.constant dense<0.000000e+00> : vector<16x512xf32>
    %41 = tpu.matmul %40, %4, %cst_16 {dimension_numbers = #tpu.dot_dimension_numbers<[1], [0], [0], [1], [0, 0, 1, 1], [], []>} : vector<16x2xf32>, vector<2x512xf32>, vector<16x512xf32> -> vector<16x512xf32>
    %42 = arith.addf %38, %41 : vector<16x512xf32>
    %c2 = arith.constant 2 : index
    %c0_17 = arith.constant 0 : index
    %c0_18 = arith.constant 0 : index
    %43 = vector.load %arg2[%c2, %c0_17, %c0_18] : memref<3x16x2xf32, #tpu.memory_space<vmem>>, vector<1x16x2xf32>
    %44 = vector.shape_cast %43 : vector<1x16x2xf32> to vector<16x2xf32>
    %cst_19 = arith.constant dense<0.000000e+00> : vector<16x512xf32>
    %45 = tpu.matmul %44, %35, %cst_19 {dimension_numbers = #tpu.dot_dimension_numbers<[1], [0], [0], [1], [0, 0, 1, 1], [], []>} : vector<16x2xf32>, vector<2x512xf32>, vector<16x512xf32> -> vector<16x512xf32>
    %46 = arith.addf %42, %45 : vector<16x512xf32>
    %c0_20 = arith.constant 0 : index
    %c0_21 = arith.constant 0 : index
    %c0_22 = arith.constant 0 : index
    %47 = vector.load %arg4[%c0_20, %c0_21, %c0_22] : memref<3x16x1xf32, #tpu.memory_space<vmem>>, vector<1x16x1xf32>
    %48 = vector.shape_cast %47 : vector<1x16x1xf32> to vector<16x1xf32>
    %49 = vector.broadcast %48 : vector<16x1xf32> to vector<16x512xf32>
    %50 = arith.addf %46, %49 : vector<16x512xf32>
    %cst_23 = arith.constant 0.000000e+00 : f32
    %51 = vector.broadcast %cst_23 : f32 to vector<16x512xf32>
    %52 = arith.maximumf %50, %51 : vector<16x512xf32>
    %c16_i32_24 = arith.constant 16 : i32
    %53 = tpu.dynamic_rotate %52 by %c16_i32_24 dim 1 : vector<16x512xf32>, i32 -> vector<16x512xf32>
    %cst_25 = arith.constant 0.000000e+00 : f32
    %54 = vector.shape_cast %23 : vector<1x512xi1> to vector<1x512xi1>
    %55 = vector.broadcast %54 : vector<1x512xi1> to vector<16x512xi1>
    %56 = vector.broadcast %cst_25 : f32 to vector<16x512xf32>
    %57 = arith.select %55, %53, %56 : vector<16x512xi1>, vector<16x512xf32>
    %c496_i32_26 = arith.constant 496 : i32
    %58 = tpu.dynamic_rotate %52 by %c496_i32_26 dim 1 : vector<16x512xf32>, i32 -> vector<16x512xf32>
    %cst_27 = arith.constant 0.000000e+00 : f32
    %59 = vector.shape_cast %25 : vector<1x512xi1> to vector<1x512xi1>
    %60 = vector.broadcast %59 : vector<1x512xi1> to vector<16x512xi1>
    %61 = vector.broadcast %cst_27 : f32 to vector<16x512xf32>
    %62 = arith.select %60, %58, %61 : vector<16x512xi1>, vector<16x512xf32>
    %63 = tpu.concatenate %57, %52, %62 in 0 : vector<16x512xf32>, vector<16x512xf32>, vector<16x512xf32> -> vector<48x512xf32>
    %c0_28 = arith.constant 0 : index
    %c0_29 = arith.constant 0 : index
    %c0_30 = arith.constant 0 : index
    %64 = vector.load %arg3[%c0_28, %c0_29, %c0_30] : memref<2x16x48xf32, #tpu.memory_space<vmem>>, vector<1x16x48xf32>
    %65 = vector.shape_cast %64 : vector<1x16x48xf32> to vector<16x48xf32>
    %cst_31 = arith.constant dense<0.000000e+00> : vector<16x512xf32>
    %66 = tpu.matmul %65, %63, %cst_31 {dimension_numbers = #tpu.dot_dimension_numbers<[1], [0], [0], [1], [0, 0, 1, 1], [], []>} : vector<16x48xf32>, vector<48x512xf32>, vector<16x512xf32> -> vector<16x512xf32>
    %c1_32 = arith.constant 1 : index
    %c0_33 = arith.constant 0 : index
    %c0_34 = arith.constant 0 : index
    %67 = vector.load %arg4[%c1_32, %c0_33, %c0_34] : memref<3x16x1xf32, #tpu.memory_space<vmem>>, vector<1x16x1xf32>
    %68 = vector.shape_cast %67 : vector<1x16x1xf32> to vector<16x1xf32>
    %69 = vector.broadcast %68 : vector<16x1xf32> to vector<16x512xf32>
    %70 = arith.addf %66, %69 : vector<16x512xf32>
    %cst_35 = arith.constant 0.000000e+00 : f32
    %71 = vector.broadcast %cst_35 : f32 to vector<16x512xf32>
    %72 = arith.maximumf %70, %71 : vector<16x512xf32>
    %c16_i32_36 = arith.constant 16 : i32
    %73 = tpu.dynamic_rotate %72 by %c16_i32_36 dim 1 : vector<16x512xf32>, i32 -> vector<16x512xf32>
    %cst_37 = arith.constant 0.000000e+00 : f32
    %74 = vector.shape_cast %23 : vector<1x512xi1> to vector<1x512xi1>
    %75 = vector.broadcast %74 : vector<1x512xi1> to vector<16x512xi1>
    %76 = vector.broadcast %cst_37 : f32 to vector<16x512xf32>
    %77 = arith.select %75, %73, %76 : vector<16x512xi1>, vector<16x512xf32>
    %c496_i32_38 = arith.constant 496 : i32
    %78 = tpu.dynamic_rotate %72 by %c496_i32_38 dim 1 : vector<16x512xf32>, i32 -> vector<16x512xf32>
    %cst_39 = arith.constant 0.000000e+00 : f32
    %79 = vector.shape_cast %25 : vector<1x512xi1> to vector<1x512xi1>
    %80 = vector.broadcast %79 : vector<1x512xi1> to vector<16x512xi1>
    %81 = vector.broadcast %cst_39 : f32 to vector<16x512xf32>
    %82 = arith.select %80, %78, %81 : vector<16x512xi1>, vector<16x512xf32>
    %83 = tpu.concatenate %77, %72, %82 in 0 : vector<16x512xf32>, vector<16x512xf32>, vector<16x512xf32> -> vector<48x512xf32>
    %c1_40 = arith.constant 1 : index
    %c0_41 = arith.constant 0 : index
    %c0_42 = arith.constant 0 : index
    %84 = vector.load %arg3[%c1_40, %c0_41, %c0_42] : memref<2x16x48xf32, #tpu.memory_space<vmem>>, vector<1x16x48xf32>
    %85 = vector.shape_cast %84 : vector<1x16x48xf32> to vector<16x48xf32>
    %cst_43 = arith.constant dense<0.000000e+00> : vector<16x512xf32>
    %86 = tpu.matmul %85, %83, %cst_43 {dimension_numbers = #tpu.dot_dimension_numbers<[1], [0], [0], [1], [0, 0, 1, 1], [], []>} : vector<16x48xf32>, vector<48x512xf32>, vector<16x512xf32> -> vector<16x512xf32>
    %c2_44 = arith.constant 2 : index
    %c0_45 = arith.constant 0 : index
    %c0_46 = arith.constant 0 : index
    %87 = vector.load %arg4[%c2_44, %c0_45, %c0_46] : memref<3x16x1xf32, #tpu.memory_space<vmem>>, vector<1x16x1xf32>
    %88 = vector.shape_cast %87 : vector<1x16x1xf32> to vector<16x1xf32>
    %89 = vector.broadcast %88 : vector<16x1xf32> to vector<16x512xf32>
    %90 = arith.addf %86, %89 : vector<16x512xf32>
    %cst_47 = arith.constant 0.000000e+00 : f32
    %91 = vector.broadcast %cst_47 : f32 to vector<16x512xf32>
    %92 = arith.maximumf %90, %91 : vector<16x512xf32>
    %93 = vector.extract_strided_slice %92 {offsets = [0, 0], sizes = [16, 256], strides = [1, 1]} : vector<16x512xf32> to vector<16x256xf32>
    %c0_48 = arith.constant 0 : index
    %c0_49 = arith.constant 0 : index
    %c0_50 = arith.constant 0 : index
    %94 = vector.load %arg5[%c0_48, %c0_49, %c0_50] : memref<2x16x256xf32, #tpu.memory_space<vmem>>, vector<1x16x256xf32>
    %95 = vector.shape_cast %94 : vector<1x16x256xf32> to vector<16x256xf32>
    %96 = vector.shape_cast %93 : vector<16x256xf32> to vector<1x16x256xf32>
    tpu.vector_store %arg5[%c0_48, %c0_49, %c0_50], %96 {strides = array<i32>} : memref<2x16x256xf32, #tpu.memory_space<vmem>>, vector<1x16x256xf32>,
    %97 = vector.extract_strided_slice %92 {offsets = [0, 256], sizes = [16, 256], strides = [1, 1]} : vector<16x512xf32> to vector<16x256xf32>
    %c1_51 = arith.constant 1 : index
    %c0_52 = arith.constant 0 : index
    %c0_53 = arith.constant 0 : index
    %98 = vector.load %arg5[%c1_51, %c0_52, %c0_53] : memref<2x16x256xf32, #tpu.memory_space<vmem>>, vector<1x16x256xf32>
    %99 = vector.shape_cast %98 : vector<1x16x256xf32> to vector<16x256xf32>
    %100 = vector.shape_cast %97 : vector<16x256xf32> to vector<1x16x256xf32>
    tpu.vector_store %arg5[%c1_51, %c0_52, %c0_53], %100 {strides = array<i32>} : memref<2x16x256xf32, #tpu.memory_space<vmem>>, vector<1x16x256xf32>,
    return
  }
  func.func @transform_0(%arg0: i32) -> (i32, i32, i32) {
    %c0_i32 = arith.constant 0 : i32
    %c0_i32_0 = arith.constant 0 : i32
    %c0_i32_1 = arith.constant 0 : i32
    %c0_i32_2 = arith.constant 0 : i32
    return %c0_i32, %c0_i32_0, %c0_i32_1 : i32, i32, i32
  }
  func.func @transform_1(%arg0: i32) -> (i32, i32, i32) {
    %c0_i32 = arith.constant 0 : i32
    %c0_i32_0 = arith.constant 0 : i32
    %c0_i32_1 = arith.constant 0 : i32
    %c0_i32_2 = arith.constant 0 : i32
    return %c0_i32, %c0_i32_0, %c0_i32_1 : i32, i32, i32
  }
  func.func @transform_2(%arg0: i32) -> (i32, i32, i32) {
    %c0_i32 = arith.constant 0 : i32
    %c0_i32_0 = arith.constant 0 : i32
    %c0_i32_1 = arith.constant 0 : i32
    %c0_i32_2 = arith.constant 0 : i32
    return %c0_i32, %c0_i32_0, %c0_i32_1 : i32, i32, i32
  }
  func.func @transform_3(%arg0: i32) -> (i32, i32, i32) {
    %c0_i32 = arith.constant 0 : i32
    %c0_i32_0 = arith.constant 0 : i32
    %c0_i32_1 = arith.constant 0 : i32
    %c0_i32_2 = arith.constant 0 : i32
    return %c0_i32, %c0_i32_0, %c0_i32_1 : i32, i32, i32
  }
  func.func @transform_4(%arg0: i32) -> (i32, i32, i32) {
    %c0_i32 = arith.constant 0 : i32
    %c0_i32_0 = arith.constant 0 : i32
    %c0_i32_1 = arith.constant 0 : i32
    %c0_i32_2 = arith.constant 0 : i32
    return %c0_i32, %c0_i32_0, %c0_i32_1 : i32, i32, i32
  }
}

</mosaic_0001>

<bundles_post_ra>
// kernel: tpu_custom_call.1
= control target key start
LH: loop header
LB: loop body
LE: loop exit
PB: predicated region body
PF: predicated region fallthrough
CT: control target
= control target key end

     0   :  { %s1478_s17 = smov 16   ;;  %vm166_vm0 = vcmask 1041408   ;;  %v1479_v4 = vmov 0.0   ;;  %vm159_vm1 = vcmask 15360   ;;  %s1828_s0 = inlined_call_operand.vmem [shape: f32[2,2,256], index: 0, kind: input, shape index: {}]   ;;  %s1829_s1 = inlined_call_operand.vmem [shape: f32[3,16,2], index: 1, kind: input, shape index: {}]   ;;  %s1830_s2 = inlined_call_operand.vmem [shape: f32[2,16,48], index: 2, kind: input, shape index: {}]   ;;  %s1831_s3 = inlined_call_operand.vmem [shape: f32[3,16,1], index: 3, kind: input, shape index: {}]   ;;  %s1832_s4 = inlined_call_operand.hbm [shape: f32[2,16,256], index: 4, kind: output, shape index: {}]  }
   0x1   :  { %v1235_v0 = vld.sshfl [vmem:[%s1828_s0 + $0x4] sm:$0x33 pattern:$0x76325410]  ;;  %239 = vmatprep.mubr.f32.mxu0 %v1479_v4  ;;  %316 = vmatprep.mubr.f32.mxu1 %v1479_v4  ;;  %v1236_v5 = vld [vmem:[%s1829_s1 + $0x10] sm:$0xff] }
   0x2   :  { %108 = vrot.lane.b32.xlu1 %v1235_v0, %s1478_s17  ;;  %v1234_v1 = vld.sshfl [vmem:[%s1828_s0] sm:$0x33 pattern:$0x76325410]  ;;  %v40_v2 = vcombine.high %v1235_v0, %v1235_v0 }
   0x3   :  { %104 = vrot.lane.b32.xlu0 %v1234_v1, %s1478_s17  ;;  %v29_v3 = vcombine.high %v1234_v1, %v1234_v1 }
   0x4   :  { %1242 = vmatprep.subr.msk.mxu1 %vm166_vm0, %v40_v2 }
   0x5   :  { %9 = vsyncpa [#allocation3], 0  ;;  %1238 = vmatprep.subr.msk.mxu0 %vm166_vm0, %v29_v3  ;;  %1243 = vmatpush1.msk.msra.mxu1 %vm166_vm0, %v1235_v0  ;;  %v1237_v6 = vld [vmem:[%s1829_s1 + $0x18] sm:$0xff]  ;;  %s1480_s23 = smov 112   ;;  %v1481_v7 = vmov 0   ;;  %v685_v8 = vld [vmem:[%s1831_s3 + $0x8] sm:$0xff]  ;;  %v43_v10 = vlaneseq }
   0x6   :  { %110 = vrot.lane.b32.xlu1 %v40_v2, %s1478_s17  ;;  %1239 = vmatpush1.msk.msra.mxu0 %vm166_vm0, %v1234_v1  ;;  %v684_v9 = vld [vmem:[%s1831_s3] sm:$0xff]  ;;  %v155_v34 = vld [vmem:[%s1829_s1 + $0x8] sm:$0xff]  ;;  %vm791_vm12 = vcmask 392192  }
   0x7   :  { %106 = vrot.lane.b32.xlu0 %v29_v3, %s1478_s17  ;;  %1240 = vmatmul.mubr.msk.f32.vlgmr.msra.gmra.mrb[0].mxu0 %vm159_vm1, %v1236_v5  ;;  %v1549_v11 = vand.u32 127, %v43_v10  ;;  %v154_v28 = vld [vmem:[%s1829_s1] sm:$0xff]  ;;  %v1255_v46 = vld [vmem:[%s1829_s1 + $0x28] sm:$0xff] }
   0x8   :  { %1244 = vmatmul.mubr.msk.f32.vlgmr.msra.gmra.mrb[0].mxu1 %vm159_vm1, %v1236_v5  ;;  %245 = vmatprep.mubr.f32.mxu0 %v1479_v4  ;;  %v1254_v42 = vld [vmem:[%s1829_s1 + $0x20] sm:$0xff] }
   0x9   :  { %322 = vmatprep.mubr.f32.mxu1 %v1479_v4  ;;  %1372 = vset.pattern.permute.xlu0 %v1481_v7  ;;  %v46_v12 = vadd.s32 256, %v1549_v11  ;;  %v52_v13 = vand.u32 255, %v1549_v11  ;;  %vm112_vm2 = vcmp.lt.s32.totalorder %v1549_v11, 16  ;;  %v47_v18 = vadd.s32 384, %v1549_v11 }
   0xa   :  { %131 = vrot.lane.b32.xlu1 %v29_v3, %s1480_s23  ;;  %v45_v21 = vadd.s32 128, %v1549_v11  ;;  %vm137_vm6 = vcmp.lt.s32.totalorder %v1549_v11, 112  ;;  %v1279_v11 = vld [vmem:[%s1830_s2 + $0x18] sm:$0xff] }
   0xb   :  { %129 = vrot.lane.b32.xlu0 %v1234_v1, %s1480_s23  ;;  %1241 = vmatmul.mubr.msk.f32.gmra.mrb[2].mxu0 %vm159_vm1, %v1237_v6  ;;  %v66_v15 = vand.u32 255, %v46_v12  ;;  %vm1554_vm3 = vcmp.ge.s32.totalorder %v52_v13, 16  ;;  %v73_v30 = vand.u32 255, %v47_v18 }
   0xc   :  { %1245 = vmatmul.mubr.msk.f32.gmra.mrb[2].mxu1 %vm159_vm1, %v1237_v6  ;;  %411 = vmatprep.mubr.f32.mxu0 %v1479_v4  ;;  %v59_v32 = vand.u32 255, %v45_v21  ;;  %v1264_v21 = vld [vmem:[%s1831_s3 + $0x10] sm:$0xff]  ;;  %vm1297_vm8 = vmpackc.low %vm1554_vm3, %vm1554_vm3 }
   0xd   :  { %488 = vmatprep.mubr.f32.mxu1 %v1479_v4  ;;  %1373 = vset.pattern.permute.xlu1 %v1481_v7  ;;  %vm1559_vm4 = vcmp.ge.s32.totalorder %v66_v15, 16  ;;  %vm1590_vm5 = vcmp.lt.s32.totalorder %v73_v30, 240 }
   0xe   :  { %135 = vrot.lane.b32.xlu1 %v40_v2, %s1480_s23  ;;  %vm1595_vm7 = vcmp.lt.s32.totalorder %v59_v32, 240  ;;  %vm1311_vm9 = vmpackc.low %vm1559_vm4, %vm1559_vm4 }
   0xf   :  { %133 = vrot.lane.b32.xlu0 %v1235_v0, %s1480_s23  ;;  %vm1304_vm10 = vmpackc.low %vm1595_vm7, %vm1595_vm7 }
  0x10   :  { %vm1318_vm11 = vmpackc.low %vm1590_vm5, %vm1590_vm5 }
  0x12   :  { %693 = vperm.xlu1 %1373, %v685_v8  }
  0x13   :  { %688 = vperm.xlu0 %1372, %v684_v9  }
  0x74   :  { %v109_v14 = vpop.permute.xlu1 %108 }
  0x75   :  { %v105_v16 = vpop.permute.xlu0 %104 }
  0x78   :  { %v111_v19 = vpop.permute.xlu1 %110 }
  0x79   :  { %v113_v22 = vsel %vm112_vm2, %v109_v14, %v111_v19  ;;  %v116_v23 = vsel %vm112_vm2, %v111_v19, %v105_v16  ;;  %v107_v24 = vpop.permute.xlu0 %106 }
  0x7a   :  { %v125_v25 = vsel %vm1554_vm3, %v116_v23, 0.0  ;;  %v114_v26 = vsel %vm112_vm2, %v107_v24, %v109_v14  ;;  %v115_v27 = vsel %vm112_vm2, %v105_v16, %v107_v24  ;;  %1250 = vmatprep.subr.msk.mxu1 %vm166_vm0, %v113_v22  ;;  %v1265_v22 = vld [vmem:[%s1831_s3 + $0x18] sm:$0xff] }
  0x7b   :  { %v127_v29 = vsel %vm1559_vm4, %v114_v26, 0.0  ;;  %1246 = vmatprep.subr.msk.mxu0 %vm166_vm0, %v115_v27 }
  0x7c   :  { %1247 = vmatpush1.msk.msra.mxu0 %vm166_vm0, %v125_v25  ;;  %1251 = vmatpush1.msk.msra.mxu1 %vm166_vm0, %v127_v29  ;;  %v132_v31 = vpop.permute.xlu1 %131 }
  0x7d   :  { %v130_v33 = vpop.permute.xlu0 %129  ;;  %1248 = vmatmul.mubr.msk.f32.vlgmr.msra.gmra.mrb[0].mxu0 %vm159_vm1, %v154_v28  ;;  %1252 = vmatmul.mubr.msk.f32.vlgmr.msra.gmra.mrb[0].mxu1 %vm159_vm1, %v154_v28 }
  0x7e   :  { %494 = vmatprep.mubr.f32.mxu1 %v1479_v4  ;;  %417 = vmatprep.mubr.f32.mxu0 %v1479_v4  ;;  %v140_v45 = vsel %vm137_vm6, %v130_v33, %v132_v31 }
  0x80   :  { %v136_v36 = vpop.permute.xlu1 %135 }
  0x81   :  { %v141_v38 = vsel %vm137_vm6, %v136_v36, %v130_v33  ;;  %v134_v39 = vpop.permute.xlu0 %133  ;;  %1249 = vmatmul.mubr.msk.f32.gmra.mrb[2].mxu0 %vm159_vm1, %v155_v34  ;;  %1253 = vmatmul.mubr.msk.f32.gmra.mrb[2].mxu1 %vm159_vm1, %v155_v34 }
  0x82   :  { %v153_v40 = vsel %vm1590_vm5, %v141_v38, 0.0  ;;  %v139_v41 = vsel %vm137_vm6, %v132_v31, %v134_v39  ;;  %586 = vmatprep.mubr.f32.mxu0 %v1479_v4  ;;  %663 = vmatprep.mubr.f32.mxu1 %v1479_v4  ;;  %v138_v43 = vsel %vm137_vm6, %v134_v39, %v136_v36 }
  0x83   :  { %v151_v44 = vsel %vm1595_vm7, %v139_v41, 0.0  ;;  %1260 = vmatprep.subr.msk.mxu1 %vm166_vm0, %v153_v40 }
  0x84   :  { %1256 = vmatprep.subr.msk.mxu0 %vm166_vm0, %v151_v44  ;;  %1261 = vmatpush1.msk.msra.mxu1 %vm166_vm0, %v138_v43 }
  0x85   :  { %1257 = vmatpush1.msk.msra.mxu0 %vm166_vm0, %v140_v45  ;;  %1262 = vmatmul.mubr.msk.f32.vlgmr.msra.gmra.mrb[0].mxu1 %vm159_vm1, %v1254_v42 }
  0x86   :  { %1258 = vmatmul.mubr.msk.f32.vlgmr.msra.gmra.mrb[0].mxu0 %vm159_vm1, %v1254_v42  ;;  %669 = vmatprep.mubr.f32.mxu1 %v1479_v4 }
  0x87   :  { %592 = vmatprep.mubr.f32.mxu0 %v1479_v4 }
  0x89   :  { %1263 = vmatmul.mubr.msk.f32.gmra.mrb[2].mxu1 %vm159_vm1, %v1255_v46 }
  0x8a   :  { %1259 = vmatmul.mubr.msk.f32.gmra.mrb[2].mxu0 %vm159_vm1, %v1255_v46  ;;  %939 = vmatprep.mubr.f32.mxu1 %v1479_v4 }
  0x8b   :  { %862 = vmatprep.mubr.f32.mxu0 %v1479_v4 }
  0x91   :  { %v694_v52 = vpop.permute.xlu1 %693 }
  0x92   :  { %v689_v48 = vpop.permute.xlu0 %688 }
 0x158   :  { %v665_v47 = vpop.f32.mrb[0].mxu1 }
 0x159   :  { %v588_v49 = vpop.f32.mrb[0].mxu0  ;;  %v667_v50 = vpop.f32.mrb[1].mxu1  ;;  %v698_v53 = vadd.f32 %v689_v48, %v665_v47 }
 0x15a   :  { %v590_v51 = vpop.f32.mrb[1].mxu0  ;;  %v696_v54 = vadd.f32 %v689_v48, %v588_v49  ;;  %v699_v56 = vadd.f32 %v689_v48, %v667_v50 }
 0x15b   :  { %v697_v55 = vadd.f32 %v689_v48, %v590_v51  ;;  %v706_v0 = vmax.f32 %v698_v53, 0.0 }
 0x15c   :  { %v671_v57 = vpop.f32.mrb[2].mxu1  ;;  %v704_v1 = vmax.f32 %v696_v54, 0.0  ;;  %v707_v6 = vmax.f32 %v699_v56, 0.0 }
 0x15d   :  { %v594_v58 = vpop.f32.mrb[2].mxu0  ;;  %v702_v59 = vadd.f32 %v694_v52, %v671_v57  ;;  %v673_v60 = vpop.f32.mrb[3].mxu1  ;;  %v705_v5 = vmax.f32 %v697_v55, 0.0 }
 0x15e   :  { %v700_v61 = vadd.f32 %v694_v52, %v594_v58  ;;  %v596_v62 = vpop.f32.mrb[3].mxu0  ;;  %v703_v63 = vadd.f32 %v694_v52, %v673_v60 }
 0x15f   :  { %v710_v2 = vmax.f32 %v702_v59, 0.0  ;;  %v701_v3 = vadd.f32 %v694_v52, %v596_v62 }
 0x160   :  { %v708_v7 = vmax.f32 %v700_v61, 0.0  ;;  %v711_v8 = vmax.f32 %v703_v63, 0.0 }
 0x161   :  { %v1633_v9 = vpack.c.bf16 %v710_v2, %v706_v0  ;;  %v709_v10 = vmax.f32 %v701_v3, 0.0  ;;  %v1379_v12 = vpack.i.bf16 %v710_v2, %v706_v0 }
 0x162   :  { %v1635_v13 = vpack.c.bf16 %v708_v7, %v704_v1  ;;  %v1374_v14 = vpack.i.bf16 %v708_v7, %v704_v1  ;;  %v1399_v15 = vpack.i.bf16 %v711_v8, %v707_v6  ;;  %v1313_v19 = vpack.c.bf16 %v711_v8, %v707_v6 }
 0x163   :  { %v1394_v16 = vpack.i.bf16 %v709_v10, %v705_v5  ;;  %v1299_v18 = vpack.c.bf16 %v709_v10, %v705_v5 }
 0x164   :  { %1375 = vrot.lane.b32.xlu1 %v1374_v14, %s1478_s17 }
 0x165   :  { %1395 = vrot.lane.b32.xlu0 %v1394_v16, %s1478_s17 }
 0x168   :  { %1380 = vrot.lane.b32.xlu1 %v1379_v12, %s1478_s17 }
 0x169   :  { %1400 = vrot.lane.b32.xlu0 %v1399_v15, %s1478_s17 }
 0x16c   :  { %1385 = vrot.lane.b32.xlu1 %v1374_v14, %s1480_s23 }
 0x16d   :  { %1405 = vrot.lane.b32.xlu0 %v1394_v16, %s1480_s23 }
 0x170   :  { %1390 = vrot.lane.b32.xlu1 %v1379_v12, %s1480_s23  ;;  %v776_v12 = vld [vmem:[%s1830_s2] sm:$0xff] }
 0x171   :  { %1410 = vrot.lane.b32.xlu0 %v1399_v15, %s1480_s23 }
 0x174   :  { %783 = vperm.xlu1 %1373, %v1264_v21  }
 0x175   :  { %788 = vperm.xlu0 %1372, %v1265_v22  }
 0x1d6   :  { %v1376_v23 = vpop.permute.xlu1 %1375 }
 0x1d7   :  { %v1378_v24 = vunpack.i.h.bf16 %v1376_v23  ;;  %v1377_v25 = vunpack.i.l.bf16 %v1376_v23  ;;  %v1396_v26 = vpop.permute.xlu0 %1395 }
 0x1d8   :  { %v1398_v27 = vunpack.i.h.bf16 %v1396_v26  ;;  %v1397_v28 = vunpack.i.l.bf16 %v1396_v26 }
 0x1da   :  { %v1381_v29 = vpop.permute.xlu1 %1380  ;;  %v732_v30 = vsel %vm112_vm2, %v1377_v25, %v1397_v28  ;;  %v733_v31 = vsel %vm112_vm2, %v1378_v24, %v1398_v27 }
 0x1db   :  { %v1383_v32 = vunpack.i.h.bf16 %v1381_v29  ;;  %v1382_v33 = vunpack.i.l.bf16 %v1381_v29  ;;  %v1401_v34 = vpop.permute.xlu0 %1400  ;;  %v1294_v36 = vpack.c.bf16 %v733_v31, %v732_v30 }
 0x1dc   :  { %v1403_v38 = vunpack.i.h.bf16 %v1401_v34  ;;  %v1402_v39 = vunpack.i.l.bf16 %v1401_v34 }
 0x1dd   :  { %v730_v40 = vsel %vm112_vm2, %v1397_v28, %v1382_v33  ;;  %1295 = vmatprep.subr.bf16.mxu0 %v1294_v36  ;;  %v731_v41 = vsel %vm112_vm2, %v1398_v27, %v1383_v32 }
 0x1de   :  { %v735_v42 = vsel %vm112_vm2, %v1403_v38, %v1378_v24  ;;  %v734_v43 = vsel %vm112_vm2, %v1402_v39, %v1377_v25  ;;  %v1386_v44 = vpop.permute.xlu1 %1385  ;;  %v728_v45 = vsel %vm112_vm2, %v1382_v33, %v1402_v39  ;;  %v729_v49 = vsel %vm112_vm2, %v1383_v32, %v1403_v38 }
 0x1df   :  { %v1296_v46 = vpack.c.bf16 %v735_v42, %v734_v43  ;;  %v1388_v47 = vunpack.i.h.bf16 %v1386_v44  ;;  %v1406_v48 = vpop.permute.xlu0 %1405  ;;  %v1387_v50 = vunpack.i.l.bf16 %v1386_v44  ;;  %v1308_v53 = vpack.c.bf16 %v729_v49, %v728_v45 }
 0x1e0   :  { %v1408_v51 = vunpack.i.h.bf16 %v1406_v48  ;;  %v1407_v52 = vunpack.i.l.bf16 %v1406_v48  ;;  %v1310_v54 = vpack.c.bf16 %v731_v41, %v730_v40 }
 0x1e1   :  { %1298 = vmatpush1.bf16.msk.msra.mxu0 %vm1297_vm8, %v1296_v46  ;;  %1309 = vmatprep.subr.bf16.mxu1 %v1308_v53 }
 0x1e2   :  { %v1391_v55 = vpop.permute.xlu1 %1390  ;;  %1300 = vmatprep.subr.bf16.mxu0 %v1299_v18  ;;  %1312 = vmatpush1.bf16.msk.msra.mxu1 %vm1311_vm9, %v1310_v54  ;;  %v765_v59 = vsel %vm137_vm6, %v1388_v47, %v1408_v51  ;;  %v764_v60 = vsel %vm137_vm6, %v1387_v50, %v1407_v52 }
 0x1e3   :  { %v1393_v56 = vunpack.i.h.bf16 %v1391_v55  ;;  %v1392_v57 = vunpack.i.l.bf16 %v1391_v55  ;;  %v1411_v58 = vpop.permute.xlu0 %1410  ;;  %1314 = vmatprep.subr.bf16.mxu1 %v1313_v19  ;;  %v1306_v6 = vpack.c.bf16 %v765_v59, %v764_v60 }
 0x1e4   :  { %v1413_v61 = vunpack.i.h.bf16 %v1411_v58  ;;  %v1412_v62 = vunpack.i.l.bf16 %v1411_v58 }
 0x1e5   :  { %v762_v63 = vsel %vm137_vm6, %v1407_v52, %v1392_v57  ;;  %v763_v0 = vsel %vm137_vm6, %v1408_v51, %v1393_v56  ;;  %1302 = vmatpush1.bf16.msra.mxu0 %v1635_v13  ;;  %v1280_v51 = vld [vmem:[%s1831_s3 + $0x20] sm:$0xff]  ;;  %v1281_v52 = vld [vmem:[%s1831_s3 + $0x28] sm:$0xff] }
 0x1e6   :  { %v1303_v1 = vpack.c.bf16 %v763_v0, %v762_v63  ;;  %v761_v2 = vsel %vm137_vm6, %v1393_v56, %v1413_v61  ;;  %v767_v3 = vsel %vm137_vm6, %v1413_v61, %v1388_v47  ;;  %v760_v5 = vsel %vm137_vm6, %v1392_v57, %v1412_v62  ;;  %1316 = vmatpush1.bf16.msra.mxu1 %v1633_v9  ;;  %v777_v9 = vld [vmem:[%s1830_s2 + $0x8] sm:$0xff] }
 0x1e7   :  { %v766_v7 = vsel %vm137_vm6, %v1412_v62, %v1387_v50  ;;  %v1320_v8 = vpack.c.bf16 %v761_v2, %v760_v5 }
 0x1e8   :  { %v1317_v10 = vpack.c.bf16 %v767_v3, %v766_v7  ;;  %1305 = vmatprep.subr.msk.bf16.mxu0 %vm1304_vm10, %v1303_v1 }
 0x1e9   :  { %1307 = vmatpush1.bf16.msra.mxu0 %v1306_v6 }
 0x1ea   :  { %1319 = vmatprep.subr.msk.bf16.mxu1 %vm1318_vm11, %v1317_v10 }
 0x1eb   :  { %1321 = vmatpush1.bf16.msra.mxu1 %v1320_v8 }
 0x1ec   :  { %1270 = vmatmul.mubr.msk.f32.vlgmr.msra.gmra.mrb[4].mxu0 %vm791_vm12, %v776_v12 }
 0x1ed   :  { %868 = vmatprep.mubr.f32.mxu0 %v1479_v4 }
 0x1ee   :  { %1276 = vmatmul.mubr.msk.f32.vlgmr.msra.gmra.mrb[4].mxu1 %vm791_vm12, %v776_v12 }
 0x1ef   :  { %945 = vmatprep.mubr.f32.mxu1 %v1479_v4 }
 0x1f0   :  { %1271 = vmatmul.mubr.msk.f32.gmra.mrb[6].mxu0 %vm791_vm12, %v777_v9 }
 0x1f1   :  { %1110 = vmatprep.mubr.f32.mxu0 %v1479_v4 }
 0x1f2   :  { %1277 = vmatmul.mubr.msk.f32.gmra.mrb[6].mxu1 %vm791_vm12, %v777_v9 }
 0x1f3   :  { %1187 = vmatprep.mubr.f32.mxu1 %v1479_v4  ;;  %v784_v15 = vpop.permute.xlu1 %783 }
 0x1f4   :  { %v789_v22 = vpop.permute.xlu0 %788 }
 0x2bf   :  { %v864_v13 = vpop.f32.mrb[4].mxu0 }
 0x2c0   :  { %v866_v14 = vpop.f32.mrb[5].mxu0  ;;  %v865_v18 = vadd.f32 %v864_v13, %v784_v15 }
 0x2c1   :  { %v941_v16 = vpop.f32.mrb[4].mxu1  ;;  %v867_v19 = vadd.f32 %v866_v14, %v784_v15 }
 0x2c2   :  { %v943_v21 = vpop.f32.mrb[5].mxu1  ;;  %v942_v23 = vadd.f32 %v941_v16, %v784_v15  ;;  %v952_v30 = vmax.f32 %v865_v18, 0.0 }
 0x2c3   :  { %v944_v24 = vadd.f32 %v943_v21, %v784_v15  ;;  %v870_v25 = vpop.f32.mrb[6].mxu0  ;;  %v953_v31 = vmax.f32 %v867_v19, 0.0 }
 0x2c4   :  { %v871_v26 = vadd.f32 %v870_v25, %v789_v22  ;;  %v872_v27 = vpop.f32.mrb[7].mxu0  ;;  %v954_v36 = vmax.f32 %v942_v23, 0.0 }
 0x2c5   :  { %v873_v28 = vadd.f32 %v872_v27, %v789_v22  ;;  %v947_v29 = vpop.f32.mrb[6].mxu1  ;;  %v955_v38 = vmax.f32 %v944_v24, 0.0 }
 0x2c6   :  { %v956_v32 = vmax.f32 %v871_v26, 0.0  ;;  %v948_v33 = vadd.f32 %v947_v29, %v789_v22  ;;  %v949_v34 = vpop.f32.mrb[7].mxu1 }
 0x2c7   :  { %v957_v39 = vmax.f32 %v873_v28, 0.0  ;;  %v950_v40 = vadd.f32 %v949_v34, %v789_v22 }
 0x2c8   :  { %v1731_v41 = vpack.c.bf16 %v956_v32, %v952_v30  ;;  %v958_v42 = vmax.f32 %v948_v33, 0.0  ;;  %v1414_v43 = vpack.i.bf16 %v956_v32, %v952_v30 }
 0x2c9   :  { %v959_v44 = vmax.f32 %v950_v40, 0.0  ;;  %v1434_v45 = vpack.i.bf16 %v957_v39, %v953_v31  ;;  %v1327_v46 = vpack.c.bf16 %v957_v39, %v953_v31 }
 0x2ca   :  { %v1733_v47 = vpack.c.bf16 %v958_v42, %v954_v36  ;;  %1415 = vrot.lane.b32.xlu1 %v1414_v43, %s1478_s17  ;;  %v1419_v48 = vpack.i.bf16 %v958_v42, %v954_v36 }
 0x2cb   :  { %1435 = vrot.lane.b32.xlu0 %v1434_v45, %s1478_s17  ;;  %v1439_v49 = vpack.i.bf16 %v959_v44, %v955_v38  ;;  %v1341_v50 = vpack.c.bf16 %v959_v44, %v955_v38 }
 0x2ce   :  { %1420 = vrot.lane.b32.xlu1 %v1419_v48, %s1478_s17 }
 0x2cf   :  { %1440 = vrot.lane.b32.xlu0 %v1439_v49, %s1478_s17 }
 0x2d2   :  { %1425 = vrot.lane.b32.xlu1 %v1414_v43, %s1480_s23 }
 0x2d3   :  { %1445 = vrot.lane.b32.xlu0 %v1434_v45, %s1480_s23 }
 0x2d6   :  { %1430 = vrot.lane.b32.xlu1 %v1419_v48, %s1480_s23 }
 0x2d7   :  { %1450 = vrot.lane.b32.xlu0 %v1439_v49, %s1480_s23 }
 0x2da   :  { %1032 = vperm.xlu1 %1373, %v1280_v51  }
 0x2db   :  { %1037 = vperm.xlu0 %1372, %v1281_v52  }
 0x33c   :  { %v1416_v53 = vpop.permute.xlu1 %1415 }
 0x33d   :  { %v1418_v54 = vunpack.i.h.bf16 %v1416_v53  ;;  %v1417_v55 = vunpack.i.l.bf16 %v1416_v53  ;;  %v1436_v56 = vpop.permute.xlu0 %1435 }
 0x33e   :  { %v1438_v57 = vunpack.i.h.bf16 %v1436_v56  ;;  %v1437_v58 = vunpack.i.l.bf16 %v1436_v56 }
 0x340   :  { %v1421_v59 = vpop.permute.xlu1 %1420  ;;  %v980_v60 = vsel %vm112_vm2, %v1417_v55, %v1437_v58  ;;  %v981_v61 = vsel %vm112_vm2, %v1418_v54, %v1438_v57 }
 0x341   :  { %v1423_v62 = vunpack.i.h.bf16 %v1421_v59  ;;  %v1422_v63 = vunpack.i.l.bf16 %v1421_v59  ;;  %v1441_v0 = vpop.permute.xlu0 %1440  ;;  %v1322_v1 = vpack.c.bf16 %v981_v61, %v980_v60 }
 0x342   :  { %v1443_v2 = vunpack.i.h.bf16 %v1441_v0  ;;  %v1442_v3 = vunpack.i.l.bf16 %v1441_v0 }
 0x343   :  { %v979_v5 = vsel %vm112_vm2, %v1438_v57, %v1423_v62  ;;  %1323 = vmatprep.subr.bf16.mxu0 %v1322_v1  ;;  %v978_v6 = vsel %vm112_vm2, %v1437_v58, %v1422_v63 }
 0x344   :  { %v982_v7 = vsel %vm112_vm2, %v1442_v3, %v1417_v55  ;;  %v983_v8 = vsel %vm112_vm2, %v1443_v2, %v1418_v54  ;;  %v1426_v10 = vpop.permute.xlu1 %1425  ;;  %v976_v12 = vsel %vm112_vm2, %v1422_v63, %v1442_v3  ;;  %v977_v15 = vsel %vm112_vm2, %v1423_v62, %v1443_v2 }
 0x345   :  { %v1324_v9 = vpack.c.bf16 %v983_v8, %v982_v7  ;;  %v1428_v13 = vunpack.i.h.bf16 %v1426_v10  ;;  %v1446_v14 = vpop.permute.xlu0 %1445  ;;  %v1427_v16 = vunpack.i.l.bf16 %v1426_v10  ;;  %v1336_v21 = vpack.c.bf16 %v977_v15, %v976_v12 }
 0x346   :  { %v1448_v18 = vunpack.i.h.bf16 %v1446_v14  ;;  %v1447_v19 = vunpack.i.l.bf16 %v1446_v14  ;;  %v1338_v22 = vpack.c.bf16 %v979_v5, %v978_v6 }
 0x347   :  { %1326 = vmatpush1.bf16.msk.msra.mxu0 %vm1297_vm8, %v1324_v9  ;;  %1337 = vmatprep.subr.bf16.mxu1 %v1336_v21 }
 0x348   :  { %v1431_v23 = vpop.permute.xlu1 %1430  ;;  %1328 = vmatprep.subr.bf16.mxu0 %v1327_v46  ;;  %1340 = vmatpush1.bf16.msk.msra.mxu1 %vm1311_vm9, %v1338_v22  ;;  %v1012_v27 = vsel %vm137_vm6, %v1427_v16, %v1447_v19  ;;  %v1013_v17 = vsel %vm137_vm6, %v1428_v13, %v1448_v18 }
 0x349   :  { %v1433_v24 = vunpack.i.h.bf16 %v1431_v23  ;;  %v1432_v25 = vunpack.i.l.bf16 %v1431_v23  ;;  %v1451_v26 = vpop.permute.xlu0 %1450  ;;  %1342 = vmatprep.subr.bf16.mxu1 %v1341_v50  ;;  %v1334_v36 = vpack.c.bf16 %v1013_v17, %v1012_v27 }
 0x34a   :  { %v1453_v28 = vunpack.i.h.bf16 %v1451_v26  ;;  %v1452_v29 = vunpack.i.l.bf16 %v1451_v26 }
 0x34b   :  { %v1011_v30 = vsel %vm137_vm6, %v1448_v18, %v1433_v24  ;;  %v1010_v31 = vsel %vm137_vm6, %v1447_v19, %v1432_v25  ;;  %1330 = vmatpush1.bf16.msra.mxu0 %v1731_v41  ;;  %v1278_v41 = vld [vmem:[%s1830_s2 + $0x10] sm:$0xff]  ;;  %s1482_s2 = smov [#allocation2]  }
 0x34c   :  { %v1331_v20 = vpack.c.bf16 %v1011_v30, %v1010_v31  ;;  %v1008_v32 = vsel %vm137_vm6, %v1432_v25, %v1452_v29  ;;  %v1009_v33 = vsel %vm137_vm6, %v1433_v24, %v1453_v28  ;;  %v1014_v34 = vsel %vm137_vm6, %v1452_v29, %v1427_v16  ;;  %1344 = vmatpush1.bf16.msra.mxu1 %v1733_v47  ;;  %s1222_s24 = sshll.u32 %s1482_s2, 4  ;;  %s1223_s24 = int_to_ptr.vmem [resolvable:$true] %s1222_s24 }
 0x34d   :  { %v1015_v38 = vsel %vm137_vm6, %v1453_v28, %v1428_v13  ;;  %v1348_v39 = vpack.c.bf16 %v1009_v33, %v1008_v32  ;;  %s1454_s25 = scalar_lea.vmem %s1223_s24, 1024  ;;  %p1459_p1 = scmp.lt.s32.totalorder %s1223_s24, %s1223_s24 }
 0x34e   :  { %v1345_v40 = vpack.c.bf16 %v1015_v38, %v1014_v34  ;;  %1333 = vmatprep.subr.msk.bf16.mxu0 %vm1304_vm10, %v1331_v20  ;;  %p1455_p0 = scmp.ne.s32.totalorder %s1223_s24, %s1454_s25  ;;  %p1460_p2 = scmp.lt.s32.totalorder %s1454_s25, %s1454_s25 }
 0x34f   :  { %1335 = vmatpush1.bf16.msra.mxu0 %v1334_v36 }
 0x350   :  { %1347 = vmatprep.subr.msk.bf16.mxu1 %vm1318_vm11, %v1345_v40  ;;  %p1461_p3 = por %p1460_p2, %p1459_p1 }
 0x351   :  { %1349 = vmatpush1.bf16.msra.mxu1 %v1348_v39 }
 0x352   :  { %1286 = vmatmul.mubr.msk.f32.vlgmr.msra.gmra.mrb[8].mxu0 %vm791_vm12, %v1278_v41  ;;  %p1462_p4 = pnand %p1461_p3, %p1455_p0 }
 0x353   :  { %1116 = vmatprep.mubr.f32.mxu0 %v1479_v4 }
 0x354   :  { %1292 = vmatmul.mubr.msk.f32.vlgmr.msra.gmra.mrb[8].mxu1 %vm791_vm12, %v1278_v41 }
 0x355   :  { %1193 = vmatprep.mubr.f32.mxu1 %v1479_v4 }
 0x356   :  { %1287 = vmatmul.mubr.msk.f32.gmra.mrb[10].mxu0 %vm791_vm12, %v1279_v11 }
 0x358   :  { %1293 = vmatmul.mubr.msk.f32.gmra.mrb[10].mxu1 %vm791_vm12, %v1279_v11 }
 0x359   :  { %v1033_v35 = vpop.permute.xlu1 %1032 }
 0x35a   :  { %v1038_v49 = vpop.permute.xlu0 %1037 }
 0x425   :  { %v1112_v37 = vpop.f32.mrb[8].mxu0 }
 0x426   :  { %v1113_v42 = vadd.f32 %v1112_v37, %v1033_v35  ;;  %v1114_v43 = vpop.f32.mrb[9].mxu0 }
 0x427   :  { %v1115_v44 = vadd.f32 %v1114_v43, %v1033_v35  ;;  %v1189_v45 = vpop.f32.mrb[8].mxu1 }
 0x428   :  { %v1200_v46 = vmax.f32 %v1113_v42, 0.0  ;;  %v1190_v47 = vadd.f32 %v1189_v45, %v1033_v35  ;;  %v1191_v48 = vpop.f32.mrb[9].mxu1 }
 0x429   :  { %v1201_v50 = vmax.f32 %v1115_v44, 0.0  ;;  %v1192_v51 = vadd.f32 %v1191_v48, %v1033_v35  ;;  %v1118_v52 = vpop.f32.mrb[10].mxu0 }
 0x42a   :  { %1208 = vst [vmem:[#allocation2] sm:$0xff] %v1200_v46  ;;  %v1202_v53 = vmax.f32 %v1190_v47, 0.0  ;;  %v1119_v4 = vadd.f32 %v1118_v52, %v1038_v49  ;;  %v1120_v54 = vpop.f32.mrb[11].mxu0 }
 0x42b   :  { %1209 = vst [vmem:[#allocation2 + $0x8] sm:$0xff] %v1201_v50  ;;  %v1203_v55 = vmax.f32 %v1192_v51, 0.0  ;;  %v1121_v56 = vadd.f32 %v1120_v54, %v1038_v49  ;;  %v1195_v57 = vpop.f32.mrb[10].mxu1 }
 0x42c   :  { %1213 = vst [vmem:[#allocation2 + $0x20] sm:$0xff] %v1202_v53  ;;  %v1204_v58 = vmax.f32 %v1119_v4, 0.0  ;;  %v1196_v59 = vadd.f32 %v1195_v57, %v1038_v49  ;;  %v1197_v60 = vpop.f32.mrb[11].mxu1 }
 0x42d   :  { %1214 = vst [vmem:[#allocation2 + $0x28] sm:$0xff] %v1203_v55  ;;  %v1205_v61 = vmax.f32 %v1121_v56, 0.0  ;;  %v1198_v62 = vadd.f32 %v1197_v60, %v1038_v49 }
 0x42e   :  { %1210 = vst [vmem:[#allocation2 + $0x10] sm:$0xff] %v1204_v58  ;;  %v1206_v63 = vmax.f32 %v1196_v59, 0.0 }
 0x42f   :  { %1211 = vst [vmem:[#allocation2 + $0x18] sm:$0xff] %v1205_v61  ;;  %v1207_v0 = vmax.f32 %v1198_v62, 0.0 }
 0x430   :  { %1215 = vst [vmem:[#allocation2 + $0x30] sm:$0xff] %v1206_v63 }
 0x431   :  { %1216 = vst [vmem:[#allocation2 + $0x38] sm:$0xff] %v1207_v0 }
 0x432   :  { %1465 = shalt.err (!%p1462_p4)
}
 0x433   :  { %s1466_s28 = scalar_lea.hbm %s1832_s4, 1024 }
 0x434   :  { %p1467_p5 = scmp.ne.s32.totalorder %s1832_s4, %s1466_s28  ;;  %p1470_p6 = scmp.lt.u32.totalorder %s1466_s28, %s1832_s4 }
 0x436   :  { %p1472_p7 = pnand %p1470_p6, %p1467_p5 }
 0x438   :  { %1475 = shalt.err (!%p1472_p7)
}
 0x439   :  { %s1483_s7 = smov 256  }
 0x43a   :  { %1228 = dma.vmem_to_hbm [thread:$0]  %s1223_s24, 1024, %s1832_s4, [#allocation3], %s1483_s7, %s1483_s7, %s1478_s17  }
 0x43b   :  { %1476 = dma.done.wait [#allocation3], 1024  }
 0x43c   :  { %1477 = vsyncadd [#allocation3], 4294966272 }
 0x43d   :  { %1232 = vsyncpa [#allocation3], 1 }

</bundles_post_ra>
